<compile_context>
chip_gen: v7x
topology: tpu7x:2x2x1
jax: 0.10.0
libtpu: 0.0.40
codegen_flags: <defaults>
</compile_context>

<pallas_src>
import jax
import jax.numpy as jnp
from jax.experimental import pallas as pl
from jax.experimental.pallas import tpu as pltpu

LANE = 128
ROW_ALIGN = 16  # bf16 sublane packing: keep batch-tile rows a multiple of 16


def _round_up(x, m):
    return ((x + m - 1) // m) * m


def _mlp_softmax_kernel(x_ref, w0_ref, b0_ref, w1_ref, b1_ref, w2_ref, b2_ref,
                        mask_ref, o_ref):
    # Layer 0: Linear + ReLU (Dropout = identity in eval).  x arrives as bf16.
    h = jnp.dot(x_ref[...], w0_ref[...], preferred_element_type=jnp.float32)
    h = jnp.maximum(h + b0_ref[...], 0.0)

    # Layer 1: Linear + ReLU.
    h = jnp.dot(h.astype(jnp.bfloat16), w1_ref[...],
                preferred_element_type=jnp.float32)
    h = jnp.maximum(h + b1_ref[...], 0.0)

    # Layer 2 (n_classes layer): Linear + ReLU (module applies ReLU here too).
    h = jnp.dot(h.astype(jnp.bfloat16), w2_ref[...],
                preferred_element_type=jnp.float32)
    h = jnp.maximum(h + b2_ref[...], 0.0)

    # Additive class-padding mask: 0 for real classes, -1e30 for padded lanes.
    h = h + mask_ref[...]

    # Numerically stable softmax; exact divide so rows sum to 1 in f32.
    m = jnp.max(h, axis=-1, keepdims=True)
    e = jnp.exp(h - m)
    o_ref[...] = e / jnp.sum(e, axis=-1, keepdims=True)


def pack_params(params):
    """One-time pre-packing: pad hidden/class dims to lane multiples (128),
    cast weights to bf16, build the additive class-padding mask.  Padding is
    mathematically identity (ReLU(0)=0; zero weight rows contribute nothing;
    padded class lanes get -1e30 before softmax)."""
    (w0, b0), (w1, b1), (w2, b2) = params
    in_features = w0.shape[0]
    h0, h1, n_classes = w0.shape[1], w1.shape[1], w2.shape[1]
    h0p, h1p, ncp = (_round_up(d, LANE) for d in (h0, h1, n_classes))

    def pad2(a, rows, cols, dtype):
        a = a.astype(dtype)
        return jnp.pad(a, ((0, rows - a.shape[0]), (0, cols - a.shape[1])))

    mask = jnp.where(jnp.arange(ncp)[None, :] < n_classes, 0.0, -1e30)
    return {
        "w0": pad2(w0, in_features, h0p, jnp.bfloat16),
        "b0": pad2(b0, 1, h0p, jnp.float32),
        "w1": pad2(w1, h0p, h1p, jnp.bfloat16),
        "b1": pad2(b1, 1, h1p, jnp.float32),
        "w2": pad2(w2, h1p, ncp, jnp.bfloat16),
        "b2": pad2(b2, 1, ncp, jnp.float32),
        "mask": mask.astype(jnp.float32),
        "dims": (int(in_features), int(h0p), int(h1p), int(ncp), int(n_classes)),
    }


def nn_forward(x, packed, *, tile_b=512):
    """x: (batch, in_features) f32; packed: output of pack_params()."""
    in_features, h0p, h1p, ncp, n_classes = packed["dims"]
    batch = x.shape[0]
    assert x.shape[1] == in_features

    # Balanced batch tiling: minimal dead padded rows, rows aligned to 16
    # (bf16 sublane packing), auto double-buffered pipelining at large batch.
    nsteps = pl.cdiv(batch, tile_b)
    tb = _round_up(pl.cdiv(batch, nsteps), ROW_ALIGN)
    padded_batch = nsteps * tb
    # Stream x as bf16 (cast fused into the pad) -> half the input DMA bytes.
    xp = jnp.pad(x, ((0, padded_batch - batch), (0, 0))).astype(jnp.bfloat16)

    def resident(shape):
        # Constant-index blocks never re-DMA; single-buffer them to save VMEM.
        return pl.BlockSpec(shape, lambda i: (0, 0), pipeline_mode=pl.Buffered(1))

    weight_bytes = 2 * (in_features * h0p + h0p * h1p + h1p * ncp)  # bf16
    stream_bytes = 2 * (2 * tb * in_features + 4 * tb * ncp)        # 2x buffered x/out
    vmem_limit = int(max(32 << 20,
                         min(2 * (weight_bytes + stream_bytes) + (4 << 20),
                             64 << 20)))

    cost = pl.CostEstimate(
        flops=2 * padded_batch * (in_features * h0p + h0p * h1p + h1p * ncp),
        transcendentals=padded_batch * ncp,
        bytes_accessed=(padded_batch * in_features * 2 + weight_bytes
                        + 4 * (h0p + h1p + 2 * ncp)
                        + padded_batch * ncp * 4),
    )

    out = pl.pallas_call(
        _mlp_softmax_kernel,
        out_shape=jax.ShapeDtypeStruct((padded_batch, ncp), jnp.float32),
        grid=(padded_batch // tb,),
        in_specs=[
            pl.BlockSpec((tb, in_features), lambda i: (i, 0)),  # x: batch-tiled stream
            resident((in_features, h0p)),
            resident((1, h0p)),
            resident((h0p, h1p)),
            resident((1, h1p)),
            resident((h1p, ncp)),
            resident((1, ncp)),
            resident((1, ncp)),                                 # class mask row
        ],
        out_specs=pl.BlockSpec((tb, ncp), lambda i: (i, 0)),    # lane-dense f32 store
        compiler_params=pltpu.CompilerParams(
            dimension_semantics=("parallel",),
            vmem_limit_bytes=vmem_limit,
        ),
        cost_estimate=cost,
    )(xp, packed["w0"], packed["b0"], packed["w1"], packed["b1"],
      packed["w2"], packed["b2"], packed["mask"])

    return out[:batch, :n_classes]


def init_params(key, in_features, hidden_nodes, n_classes):
    """Deterministic init mimicking PyTorch Linear default U(-1/sqrt(fan_in), +)."""
    sizes = [in_features] + hidden_nodes + [n_classes]
    params = []
    for i in range(len(sizes) - 1):
        fan_in, fan_out = sizes[i], sizes[i + 1]
        key, kw, kb = jax.random.split(key, 3)
        bound = 1.0 / (fan_in ** 0.5)
        w = jax.random.uniform(kw, (fan_in, fan_out), jnp.float32, -bound, bound)
        b = jax.random.uniform(kb, (1, fan_out), jnp.float32, -bound, bound)
        params.append((w, b))
    return params


def reference_forward(x, params):
    h = x.astype(jnp.float32)
    for w, b in params:
        h = jnp.maximum(h @ w + b, 0.0)   # ReLU after every layer incl. the last
    return jax.nn.softmax(h, axis=-1)


if __name__ == "__main__":
    key = jax.random.PRNGKey(0)
    batch, in_features = 8, 16
    hidden_nodes = [32, 32]
    n_classes = 2

    kx, kp = jax.random.split(key)
    x = jax.random.normal(kx, (batch, in_features), jnp.float32)
    params = init_params(kp, in_features, hidden_nodes, n_classes)
    packed = pack_params(params)   # one-time pre-packing (hoisted out of forward)

    out = jax.block_until_ready(nn_forward(x, packed))
    ref = reference_forward(x, params)

    assert out.shape == (batch, n_classes)
    # bf16 MXU operands -> relaxed tolerance vs. f32 reference.
    assert jnp.allclose(out, ref, atol=3e-2, rtol=3e-2)
    # Exact f32 divide in the softmax -> rows sum to 1 to f32 precision.
    assert jnp.allclose(jnp.sum(out, axis=-1), 1.0, atol=1e-3)
    print("KERNEL_OK")
</pallas_src>

<mosaic_0001>
module attributes {stable_mosaic.version = 11 : i64} {
  func.func @_mlp_softmax_kernel(%arg0: i32, %arg1: memref<16x16xbf16, #tpu.memory_space<vmem>>, %arg2: memref<16x128xbf16, #tpu.memory_space<vmem>>, %arg3: memref<1x128xf32, #tpu.memory_space<vmem>>, %arg4: memref<128x128xbf16, #tpu.memory_space<vmem>>, %arg5: memref<1x128xf32, #tpu.memory_space<vmem>>, %arg6: memref<128x128xbf16, #tpu.memory_space<vmem>>, %arg7: memref<1x128xf32, #tpu.memory_space<vmem>>, %arg8: memref<1x128xf32, #tpu.memory_space<vmem>>, %arg9: memref<16x128xf32, #tpu.memory_space<vmem>>) attributes {dimension_semantics = [#tpu.dimension_semantics<parallel>], iteration_bounds = array<i64: 1>, scalar_prefetch = 0 : i64, scratch_operands = 0 : i64, tpu.core_type = #tpu.core_type<tc>, window_params = [{transform_indices = @transform_0, window_bounds = array<i64: 16, 16>}, {pipeline_mode = #tpu.pipeline_mode<synchronous>, transform_indices = @transform_1, window_bounds = array<i64: 16, 128>}, {pipeline_mode = #tpu.pipeline_mode<synchronous>, transform_indices = @transform_2, window_bounds = array<i64: 1, 128>}, {pipeline_mode = #tpu.pipeline_mode<synchronous>, transform_indices = @transform_3, window_bounds = array<i64: 128, 128>}, {pipeline_mode = #tpu.pipeline_mode<synchronous>, transform_indices = @transform_4, window_bounds = array<i64: 1, 128>}, {pipeline_mode = #tpu.pipeline_mode<synchronous>, transform_indices = @transform_5, window_bounds = array<i64: 128, 128>}, {pipeline_mode = #tpu.pipeline_mode<synchronous>, transform_indices = @transform_6, window_bounds = array<i64: 1, 128>}, {pipeline_mode = #tpu.pipeline_mode<synchronous>, transform_indices = @transform_7, window_bounds = array<i64: 1, 128>}, {transform_indices = @transform_8, window_bounds = array<i64: 16, 128>}]} {
    %c0 = arith.constant 0 : index
    %c0_0 = arith.constant 0 : index
    %0 = vector.load %arg1[%c0, %c0_0] : memref<16x16xbf16, #tpu.memory_space<vmem>>, vector<16x16xbf16>
    %c0_1 = arith.constant 0 : index
    %c0_2 = arith.constant 0 : index
    %1 = vector.load %arg2[%c0_1, %c0_2] : memref<16x128xbf16, #tpu.memory_space<vmem>>, vector<16x128xbf16>
    %cst = arith.constant dense<0.000000e+00> : vector<16x128xf32>
    %2 = tpu.matmul %0, %1, %cst {dimension_numbers = #tpu.dot_dimension_numbers<[1], [0], [0], [1], [0, 0, 1, 1], [], []>} : vector<16x16xbf16>, vector<16x128xbf16>, vector<16x128xf32> -> vector<16x128xf32>
    %c0_3 = arith.constant 0 : index
    %c0_4 = arith.constant 0 : index
    %3 = vector.load %arg3[%c0_3, %c0_4] : memref<1x128xf32, #tpu.memory_space<vmem>>, vector<1x128xf32>
    %4 = vector.broadcast %3 : vector<1x128xf32> to vector<16x128xf32>
    %5 = arith.addf %2, %4 : vector<16x128xf32>
    %cst_5 = arith.constant 0.000000e+00 : f32
    %6 = vector.broadcast %cst_5 : f32 to vector<16x128xf32>
    %7 = arith.maximumf %5, %6 : vector<16x128xf32>
    %8 = arith.truncf %7 : vector<16x128xf32> to vector<16x128xbf16>
    %c0_6 = arith.constant 0 : index
    %c0_7 = arith.constant 0 : index
    %9 = vector.load %arg4[%c0_6, %c0_7] : memref<128x128xbf16, #tpu.memory_space<vmem>>, vector<128x128xbf16>
    %cst_8 = arith.constant dense<0.000000e+00> : vector<16x128xf32>
    %10 = tpu.matmul %8, %9, %cst_8 {dimension_numbers = #tpu.dot_dimension_numbers<[1], [0], [0], [1], [0, 0, 1, 1], [], []>} : vector<16x128xbf16>, vector<128x128xbf16>, vector<16x128xf32> -> vector<16x128xf32>
    %c0_9 = arith.constant 0 : index
    %c0_10 = arith.constant 0 : index
    %11 = vector.load %arg5[%c0_9, %c0_10] : memref<1x128xf32, #tpu.memory_space<vmem>>, vector<1x128xf32>
    %12 = vector.broadcast %11 : vector<1x128xf32> to vector<16x128xf32>
    %13 = arith.addf %10, %12 : vector<16x128xf32>
    %cst_11 = arith.constant 0.000000e+00 : f32
    %14 = vector.broadcast %cst_11 : f32 to vector<16x128xf32>
    %15 = arith.maximumf %13, %14 : vector<16x128xf32>
    %16 = arith.truncf %15 : vector<16x128xf32> to vector<16x128xbf16>
    %c0_12 = arith.constant 0 : index
    %c0_13 = arith.constant 0 : index
    %17 = vector.load %arg6[%c0_12, %c0_13] : memref<128x128xbf16, #tpu.memory_space<vmem>>, vector<128x128xbf16>
    %cst_14 = arith.constant dense<0.000000e+00> : vector<16x128xf32>
    %18 = tpu.matmul %16, %17, %cst_14 {dimension_numbers = #tpu.dot_dimension_numbers<[1], [0], [0], [1], [0, 0, 1, 1], [], []>} : vector<16x128xbf16>, vector<128x128xbf16>, vector<16x128xf32> -> vector<16x128xf32>
    %c0_15 = arith.constant 0 : index
    %c0_16 = arith.constant 0 : index
    %19 = vector.load %arg7[%c0_15, %c0_16] : memref<1x128xf32, #tpu.memory_space<vmem>>, vector<1x128xf32>
    %20 = vector.broadcast %19 : vector<1x128xf32> to vector<16x128xf32>
    %21 = arith.addf %18, %20 : vector<16x128xf32>
    %cst_17 = arith.constant 0.000000e+00 : f32
    %22 = vector.broadcast %cst_17 : f32 to vector<16x128xf32>
    %23 = arith.maximumf %21, %22 : vector<16x128xf32>
    %c0_18 = arith.constant 0 : index
    %c0_19 = arith.constant 0 : index
    %24 = vector.load %arg8[%c0_18, %c0_19] : memref<1x128xf32, #tpu.memory_space<vmem>>, vector<1x128xf32>
    %25 = vector.broadcast %24 : vector<1x128xf32> to vector<16x128xf32>
    %26 = arith.addf %23, %25 : vector<16x128xf32>
    %cst_20 = arith.constant dense<0xFF800000> : vector<16xf32>
    %27 = vector.multi_reduction <maximumf>, %26, %cst_20 [1] : vector<16x128xf32> to vector<16xf32>
    %28 = vector.shape_cast %27 : vector<16xf32> to vector<16x1xf32>
    %29 = vector.broadcast %28 : vector<16x1xf32> to vector<16x128xf32>
    %30 = arith.subf %26, %29 : vector<16x128xf32>
    %31 = math.exp %30 : vector<16x128xf32>
    %cst_21 = arith.constant dense<0.000000e+00> : vector<16xf32>
    %32 = vector.multi_reduction <add>, %31, %cst_21 [1] : vector<16x128xf32> to vector<16xf32>
    %33 = vector.shape_cast %32 : vector<16xf32> to vector<16x1xf32>
    %34 = vector.broadcast %33 : vector<16x1xf32> to vector<16x128xf32>
    %35 = arith.divf %31, %34 : vector<16x128xf32>
    %c0_22 = arith.constant 0 : index
    %c0_23 = arith.constant 0 : index
    %36 = vector.load %arg9[%c0_22, %c0_23] : memref<16x128xf32, #tpu.memory_space<vmem>>, vector<16x128xf32>
    tpu.vector_store %arg9[%c0_22, %c0_23], %35 {strides = array<i32>} : memref<16x128xf32, #tpu.memory_space<vmem>>, vector<16x128xf32>,
    return
  }
  func.func @transform_0(%arg0: i32) -> (i32, i32) {
    %c0_i32 = arith.constant 0 : i32
    %c0_i32_0 = arith.constant 0 : i32
    return %arg0, %c0_i32 : i32, i32
  }
  func.func @transform_1(%arg0: i32) -> (i32, i32) {
    %c0_i32 = arith.constant 0 : i32
    %c0_i32_0 = arith.constant 0 : i32
    %c0_i32_1 = arith.constant 0 : i32
    return %c0_i32, %c0_i32_0 : i32, i32
  }
  func.func @transform_2(%arg0: i32) -> (i32, i32) {
    %c0_i32 = arith.constant 0 : i32
    %c0_i32_0 = arith.constant 0 : i32
    %c0_i32_1 = arith.constant 0 : i32
    return %c0_i32, %c0_i32_0 : i32, i32
  }
  func.func @transform_3(%arg0: i32) -> (i32, i32) {
    %c0_i32 = arith.constant 0 : i32
    %c0_i32_0 = arith.constant 0 : i32
    %c0_i32_1 = arith.constant 0 : i32
    return %c0_i32, %c0_i32_0 : i32, i32
  }
  func.func @transform_4(%arg0: i32) -> (i32, i32) {
    %c0_i32 = arith.constant 0 : i32
    %c0_i32_0 = arith.constant 0 : i32
    %c0_i32_1 = arith.constant 0 : i32
    return %c0_i32, %c0_i32_0 : i32, i32
  }
  func.func @transform_5(%arg0: i32) -> (i32, i32) {
    %c0_i32 = arith.constant 0 : i32
    %c0_i32_0 = arith.constant 0 : i32
    %c0_i32_1 = arith.constant 0 : i32
    return %c0_i32, %c0_i32_0 : i32, i32
  }
  func.func @transform_6(%arg0: i32) -> (i32, i32) {
    %c0_i32 = arith.constant 0 : i32
    %c0_i32_0 = arith.constant 0 : i32
    %c0_i32_1 = arith.constant 0 : i32
    return %c0_i32, %c0_i32_0 : i32, i32
  }
  func.func @transform_7(%arg0: i32) -> (i32, i32) {
    %c0_i32 = arith.constant 0 : i32
    %c0_i32_0 = arith.constant 0 : i32
    %c0_i32_1 = arith.constant 0 : i32
    return %c0_i32, %c0_i32_0 : i32, i32
  }
  func.func @transform_8(%arg0: i32) -> (i32, i32) {
    %c0_i32 = arith.constant 0 : i32
    %c0_i32_0 = arith.constant 0 : i32
    return %arg0, %c0_i32 : i32, i32
  }
}

</mosaic_0001>

<bundles_post_ra>
// kernel: tpu_custom_call.1
= control target key start
LH: loop header
LB: loop body
LE: loop exit
PB: predicated region body
PF: predicated region fallthrough
CT: control target
= control target key end

     0   :  { %13 = vsyncpa [#allocation3], 0  ;;  %s851_s0 = inlined_call_operand.hbm [shape: bf16[16,16], index: 0, kind: input, shape index: {}]   ;;  %s852_s1 = inlined_call_operand.hbm [shape: bf16[16,128], index: 1, kind: input, shape index: {}]   ;;  %s853_s2 = inlined_call_operand.vmem [shape: f32[1,128], index: 2, kind: input, shape index: {}]   ;;  %s854_s3 = inlined_call_operand.hbm [shape: bf16[128,128], index: 3, kind: input, shape index: {}]   ;;  %s855_s4 = inlined_call_operand.vmem [shape: f32[1,128], index: 4, kind: input, shape index: {}]   ;;  %s856_s5 = inlined_call_operand.hbm [shape: bf16[128,128], index: 5, kind: input, shape index: {}]   ;;  %s857_s6 = inlined_call_operand.vmem [shape: f32[1,128], index: 6, kind: input, shape index: {}]   ;;  %s858_s7 = inlined_call_operand.vmem [shape: f32[1,128], index: 7, kind: input, shape index: {}]   ;;  %s859_s8 = inlined_call_operand.hbm [shape: f32[16,128], index: 8, kind: output, shape index: {}]  }
   0x1   :  { %14 = vsyncpa [#allocation6], 0 }
   0x2   :  { %15 = vsyncpa [#allocation9], 0 }
   0x3   :  { %16 = vsyncpa [#allocation4], 0  ;;  %s677_s27 = smov [#allocation5]   ;;  %s678_s29 = smov [#allocation2]  }
   0x4   :  { %s34_s28 = sshll.u32 %s677_s27, 4  ;;  %s22_s30 = sshll.u32 %s678_s29, 4  ;;  %s35_s28 = int_to_ptr.vmem [resolvable:$true] %s34_s28  ;;  %s733_s30 = int_to_ptr.vmem [resolvable:$true] %s22_s30 }
   0x5   :  { %s559_s11 = scalar_lea.hbm %s852_s1, 128 }
   0x6   :  { %p560_p0 = scmp.ne.s32.totalorder %s852_s1, %s559_s11  ;;  %p563_p1 = scmp.lt.u32.totalorder %s559_s11, %s852_s1 }
   0x8   :  { %p565_p2 = pnand %p563_p1, %p560_p0 }
   0xa   :  { %568 = shalt.err (!%p565_p2)
}
   0xb   :  { %s569_s16 = scalar_lea.vmem %s35_s28, 128  ;;  %p574_p4 = scmp.lt.s32.totalorder %s35_s28, %s35_s28 }
   0xc   :  { %p570_p3 = scmp.ne.s32.totalorder %s35_s28, %s569_s16  ;;  %p575_p5 = scmp.lt.s32.totalorder %s569_s16, %s569_s16 }
   0xe   :  { %p576_p6 = por %p575_p5, %p574_p4 }
  0x10   :  { %p577_p7 = pnand %p576_p6, %p570_p3 }
  0x12   :  { %580 = shalt.err (!%p577_p7)
}
  0x13   :  { %s679_s17 = smov 64   ;;  %s680_s18 = smov 4  }
  0x14   :  { %40 = dma.hbm_to_vmem [thread:$0]  %s852_s1, 128, %s35_s28, [#allocation6], %s679_s17, %s679_s17, %s680_s18  }
  0x15   :  { %s581_s23 = scalar_lea.hbm %s851_s0, 128 }
  0x16   :  { %p582_p8 = scmp.ne.s32.totalorder %s851_s0, %s581_s23  ;;  %p585_p9 = scmp.lt.u32.totalorder %s581_s23, %s851_s0 }
  0x18   :  { %p587_p10 = pnand %p585_p9, %p582_p8 }
  0x1a   :  { %590 = shalt.err (!%p587_p10)
}
  0x1b   :  { %s591_s29 = scalar_lea.vmem %s733_s30, 128  ;;  %p596_p12 = scmp.lt.s32.totalorder %s733_s30, %s733_s30 }
  0x1c   :  { %p592_p11 = scmp.ne.s32.totalorder %s733_s30, %s591_s29  ;;  %p597_p13 = scmp.lt.s32.totalorder %s591_s29, %s591_s29 }
  0x1e   :  { %p598_p0 = por %p597_p13, %p596_p12 }
  0x20   :  { %p599_p1 = pnand %p598_p0, %p592_p11 }
  0x22   :  { %602 = shalt.err (!%p599_p1)
}
  0x23   :  { %28 = dma.hbm_to_vmem [thread:$0]  %s851_s0, 128, %s733_s30, [#allocation3], %s679_s17, %s679_s17, %s680_s18  }
  0x24   :  { %s681_s9 = smov [#allocation7]   ;;  %s682_s11 = smov [#allocation8]  }
  0x25   :  { %s48_s10 = sshll.u32 %s681_s9, 4  ;;  %s62_s12 = sshll.u32 %s682_s11, 4  ;;  %s49_s10 = int_to_ptr.vmem [resolvable:$true] %s48_s10  ;;  %s770_s12 = int_to_ptr.vmem [resolvable:$true] %s62_s12 }
  0x26   :  { %s603_s15 = scalar_lea.hbm %s854_s3, 1024 }
  0x27   :  { %p604_p2 = scmp.ne.s32.totalorder %s854_s3, %s603_s15  ;;  %p607_p3 = scmp.lt.u32.totalorder %s603_s15, %s854_s3 }
  0x29   :  { %p609_p4 = pnand %p607_p3, %p604_p2 }
  0x2b   :  { %612 = shalt.err (!%p609_p4)
}
  0x2c   :  { %s613_s0 = scalar_lea.vmem %s49_s10, 1024  ;;  %p618_p6 = scmp.lt.s32.totalorder %s49_s10, %s49_s10 }
  0x2d   :  { %p614_p5 = scmp.ne.s32.totalorder %s49_s10, %s613_s0  ;;  %p619_p7 = scmp.lt.s32.totalorder %s613_s0, %s613_s0 }
  0x2f   :  { %p620_p8 = por %p619_p7, %p618_p6 }
  0x31   :  { %p621_p9 = pnand %p620_p8, %p614_p5 }
  0x33   :  { %624 = shalt.err (!%p621_p9)
}
  0x34   :  { %54 = dma.hbm_to_vmem [thread:$0]  %s854_s3, 1024, %s49_s10, [#allocation6], %s679_s17, %s679_s17, %s680_s18  }
  0x35   :  { %s625_s25 = scalar_lea.hbm %s856_s5, 1024 }
  0x36   :  { %p626_p10 = scmp.ne.s32.totalorder %s856_s5, %s625_s25  ;;  %p629_p11 = scmp.lt.u32.totalorder %s625_s25, %s856_s5 }
  0x38   :  { %p631_p12 = pnand %p629_p11, %p626_p10 }
  0x3a   :  { %634 = shalt.err (!%p631_p12)
}
  0x3b   :  { %s635_s28 = scalar_lea.vmem %s770_s12, 1024  ;;  %p640_p0 = scmp.lt.s32.totalorder %s770_s12, %s770_s12 }
  0x3c   :  { %p636_p13 = scmp.ne.s32.totalorder %s770_s12, %s635_s28  ;;  %p641_p1 = scmp.lt.s32.totalorder %s635_s28, %s635_s28 }
  0x3e   :  { %p642_p2 = por %p641_p1, %p640_p0 }
  0x40   :  { %p643_p3 = pnand %p642_p2, %p636_p13 }
  0x42   :  { %646 = shalt.err (!%p643_p3)
}
  0x43   :  { %68 = dma.hbm_to_vmem [thread:$0]  %s856_s5, 1024, %s770_s12, [#allocation9], %s679_s17, %s679_s17, %s680_s18  }
  0x44   :  { %669 = dma.done.wait [#allocation3], 128  }
  0x45   :  { %670 = vsyncadd [#allocation3], 4294967168 }
  0x46   :  { %671 = dma.done.wait [#allocation6], 1152  }
  0x47   :  { %672 = vsyncadd [#allocation6], 4294966144 }
  0x48   :  { %673 = dma.done.wait [#allocation9], 1024  }
  0x49   :  { %674 = vsyncadd [#allocation9], 4294966272  ;;  %v683_v0 = vmov 0.0   ;;  %vm684_vm0 = vmmov 0   ;;  %v533_v1 = vld [vmem:[#allocation5] sm:$0xff]   ;;  %v534_v2 = vld [vmem:[#allocation2] sm:$0xff]  }
  0x4a   :  { %476 = vmatprep.subr.bf16.mxu0 %v683_v0  ;;  %478 = vmatprep.mubr.msk.bf16.mxu0 %vm684_vm0, %v683_v0  ;;  %vm108_vm1 = vcmask 130048   ;;  %v535_v3 = vld [vmem:[#allocation7] sm:$0xff]   ;;  %v536_v4 = vld [vmem:[#allocation7 + $0x8] sm:$0xff]   ;;  %v537_v5 = vld [vmem:[#allocation7 + $0x10] sm:$0xff]  }
  0x4b   :  { %482 = vmatprep.subr.bf16.mxu1 %v683_v0  ;;  %498 = vmatprep.mubr.msk.bf16.mxu1 %vm684_vm0, %v683_v0  ;;  %v538_v6 = vld [vmem:[#allocation7 + $0x18] sm:$0xff]   ;;  %v539_v7 = vld [vmem:[#allocation7 + $0x20] sm:$0xff]   ;;  %v540_v8 = vld [vmem:[#allocation7 + $0x28] sm:$0xff]  }
  0x4c   :  { %477 = vmatpush3.bf16.msra.mxu0 %v533_v1  ;;  %483 = vmatpush3.bf16.msra.mxu1 %v535_v3  ;;  %v541_v9 = vld [vmem:[#allocation7 + $0x30] sm:$0xff]   ;;  %v542_v10 = vld [vmem:[#allocation7 + $0x38] sm:$0xff]   ;;  %v543_v11 = vld [vmem:[#allocation8] sm:$0xff]  }
  0x4d   :  { %502 = vmatprep.subr.bf16.mxu0 %v683_v0  ;;  %484 = vmatprep.subr.bf16.mxu1 %v683_v0  ;;  %v544_v12 = vld [vmem:[#allocation8 + $0x8] sm:$0xff]   ;;  %v545_v13 = vld [vmem:[#allocation8 + $0x10] sm:$0xff]   ;;  %v546_v14 = vld [vmem:[#allocation8 + $0x18] sm:$0xff]  }
  0x4e   :  { %v547_v15 = vld [vmem:[#allocation8 + $0x20] sm:$0xff]   ;;  %v548_v16 = vld [vmem:[#allocation8 + $0x28] sm:$0xff]   ;;  %v433_v17 = vld [vmem:[%s853_s2] ss:$0 sm:$0xff] }
  0x4f   :  { %479 = vmatmul.mubr.msk.bf16.vlgmr.msra.gmra.mrb[0].mxu0 %vm108_vm1, %v534_v2  ;;  %v549_v27 = vld [vmem:[#allocation8 + $0x30] sm:$0xff]   ;;  %v550_v28 = vld [vmem:[#allocation8 + $0x38] sm:$0xff]  }
  0x50   :  { %518 = vmatprep.mubr.msk.bf16.mxu0 %vm684_vm0, %v683_v0  ;;  %485 = vmatpush3.bf16.msra.mxu1 %v536_v4  ;;  %v437_v29 = vld [vmem:[%s855_s4] ss:$0 sm:$0xff] }
  0x51   :  { %486 = vmatprep.subr.bf16.mxu1 %v683_v0  ;;  %503 = vmatpush3.bf16.msra.mxu0 %v543_v11  ;;  %v446_v39 = vld [vmem:[%s857_s6] ss:$0 sm:$0xff]  ;;  %s685_s6 = smov [#allocation10]  }
  0x52   :  { %504 = vmatprep.subr.bf16.mxu0 %v683_v0  ;;  %v455_v44 = vld [vmem:[%s858_s7] ss:$0 sm:$0xff]  ;;  %s419_s7 = sshll.u32 %s685_s6, 4  ;;  %s420_s7 = int_to_ptr.vmem [resolvable:$true] %s419_s7 }
  0x53   :  { %s647_s13 = scalar_lea.vmem %s420_s7, 256  ;;  %p652_p5 = scmp.lt.s32.totalorder %s420_s7, %s420_s7 }
  0x54   :  { %487 = vmatpush3.bf16.msra.mxu1 %v537_v5  ;;  %p648_p4 = scmp.ne.s32.totalorder %s420_s7, %s647_s13  ;;  %p653_p6 = scmp.lt.s32.totalorder %s647_s13, %s647_s13 }
  0x55   :  { %488 = vmatprep.subr.bf16.mxu1 %v683_v0  ;;  %505 = vmatpush3.bf16.msra.mxu0 %v544_v12 }
  0x56   :  { %506 = vmatprep.subr.bf16.mxu0 %v683_v0  ;;  %p654_p7 = por %p653_p6, %p652_p5 }
  0x58   :  { %489 = vmatpush3.bf16.msra.mxu1 %v538_v6  ;;  %p655_p8 = pnand %p654_p7, %p648_p4 }
  0x59   :  { %490 = vmatprep.subr.bf16.mxu1 %v683_v0  ;;  %507 = vmatpush3.bf16.msra.mxu0 %v545_v13 }
  0x5a   :  { %508 = vmatprep.subr.bf16.mxu0 %v683_v0 }
  0x5c   :  { %491 = vmatpush3.bf16.msra.mxu1 %v539_v7 }
  0x5d   :  { %492 = vmatprep.subr.bf16.mxu1 %v683_v0  ;;  %509 = vmatpush3.bf16.msra.mxu0 %v546_v14 }
  0x5e   :  { %510 = vmatprep.subr.bf16.mxu0 %v683_v0 }
  0x60   :  { %493 = vmatpush3.bf16.msra.mxu1 %v540_v8 }
  0x61   :  { %494 = vmatprep.subr.bf16.mxu1 %v683_v0  ;;  %511 = vmatpush3.bf16.msra.mxu0 %v547_v15 }
  0x62   :  { %512 = vmatprep.subr.bf16.mxu0 %v683_v0 }
  0x64   :  { %495 = vmatpush3.bf16.msra.mxu1 %v541_v9 }
  0x65   :  { %496 = vmatprep.subr.bf16.mxu1 %v683_v0  ;;  %513 = vmatpush3.bf16.msra.mxu0 %v548_v16 }
  0x66   :  { %514 = vmatprep.subr.bf16.mxu0 %v683_v0 }
  0x68   :  { %497 = vmatpush3.bf16.msra.mxu1 %v542_v10 }
  0x69   :  { %515 = vmatpush3.bf16.msra.mxu0 %v549_v27 }
  0x6a   :  { %516 = vmatprep.subr.bf16.mxu0 %v683_v0 }
  0x6d   :  { %517 = vmatpush3.bf16.msra.mxu0 %v550_v28 }
 0x122   :  { %v146_v18 = vpop.f32.mrb[0].mxu0 }
 0x123   :  { %v147_v19 = vadd.f32 %v433_v17, %v146_v18  ;;  %v480_v20 = vpop.f32.mrb[1].mxu0 }
 0x124   :  { %v149_v21 = vpop.f32.mrb[2].mxu0 }
 0x125   :  { %v150_v22 = vadd.f32 %v433_v17, %v149_v21  ;;  %v481_v23 = vpop.f32.mrb[3].mxu0  ;;  %v153_v24 = vmax.f32 %v147_v19, 0.0 }
 0x127   :  { %v154_v25 = vmax.f32 %v150_v22, 0.0 }
 0x129   :  { %v155_v26 = vpack.c.bf16 %v154_v25, %v153_v24 }
 0x12b   :  { %499 = vmatmul.mubr.bf16.vlgmr.msra.gmra.mrb[0].mxu1 %v155_v26 }
 0x1fe   :  { %v261_v30 = vpop.f32.mrb[0].mxu1 }
 0x1ff   :  { %v262_v31 = vadd.f32 %v437_v29, %v261_v30  ;;  %v500_v32 = vpop.f32.mrb[1].mxu1 }
 0x200   :  { %v264_v33 = vpop.f32.mrb[2].mxu1 }
 0x201   :  { %v265_v34 = vadd.f32 %v437_v29, %v264_v33  ;;  %v501_v35 = vpop.f32.mrb[3].mxu1  ;;  %v268_v36 = vmax.f32 %v262_v31, 0.0 }
 0x203   :  { %v269_v37 = vmax.f32 %v265_v34, 0.0 }
 0x205   :  { %v270_v38 = vpack.c.bf16 %v269_v37, %v268_v36 }
 0x207   :  { %519 = vmatmul.mubr.bf16.vlgmr.msra.gmra.mrb[4].mxu0 %v270_v38 }
 0x2da   :  { %v376_v40 = vpop.f32.mrb[4].mxu0 }
 0x2db   :  { %v377_v41 = vadd.f32 %v446_v39, %v376_v40  ;;  %v520_v42 = vpop.f32.mrb[5].mxu0 }
 0x2dc   :  { %v379_v43 = vpop.f32.mrb[6].mxu0 }
 0x2dd   :  { %v383_v45 = vmax.f32 %v377_v41, 0.0  ;;  %v380_v46 = vadd.f32 %v446_v39, %v379_v43  ;;  %v521_v47 = vpop.f32.mrb[7].mxu0 }
 0x2df   :  { %v384_v48 = vmax.f32 %v380_v46, 0.0  ;;  %v392_v49 = vadd.f32 %v455_v44, %v383_v45 }
 0x2e1   :  { %394 = vmax.xlane.f32.xlu0 %v392_v49  ;;  %v393_v50 = vadd.f32 %v455_v44, %v384_v48 }
 0x2e5   :  { %396 = vmax.xlane.f32.xlu0 %v393_v50 }
 0x36e   :  { %v395_v51 = vpop.xlane.xlu0 %394 }
 0x36f   :  { %v398_v52 = vsub.f32 %v392_v49, %v395_v51 }
 0x371   :  { %v400_v53 = vmul.f32 1.442695, %v398_v52 }
 0x372   :  { %v397_v54 = vpop.xlane.xlu0 %396 }
 0x373   :  { %551 = vpow2.f32 %v400_v53  ;;  %v399_v55 = vsub.f32 %v393_v50, %v397_v54 }
 0x375   :  { %v402_v56 = vmul.f32 1.442695, %v399_v55 }
 0x377   :  { %553 = vpow2.f32 %v402_v56 }
 0x37d   :  { %v552_v57 = vpop.eup %551 }
 0x37e   :  { %404 = vadd.xlane.f32.xlu1 %v552_v57 }
 0x381   :  { %v554_v58 = vpop.eup %553 }
 0x382   :  { %406 = vadd.xlane.f32.xlu1 %v554_v58 }
 0x40b   :  { %v405_v59 = vpop.xlane.xlu1 %404 }
 0x40c   :  { %555 = vrcp.f32 %v405_v59 }
 0x40f   :  { %v407_v60 = vpop.xlane.xlu1 %406 }
 0x410   :  { %557 = vrcp.f32 %v407_v60 }
 0x416   :  { %v556_v61 = vpop.eup %555 }
 0x417   :  { %v409_v62 = vmul.f32 %v556_v61, %v552_v57 }
 0x419   :  { %412 = vst [vmem:[#allocation10] sm:$0xff] %v409_v62 }
 0x41a   :  { %v558_v63 = vpop.eup %557 }
 0x41b   :  { %v411_v0 = vmul.f32 %v558_v63, %v554_v58 }
 0x41d   :  { %413 = vst [vmem:[#allocation10 + $0x8] sm:$0xff] %v411_v0 }
 0x41e   :  { %658 = shalt.err (!%p655_p8)
}
 0x41f   :  { %s659_s16 = scalar_lea.hbm %s859_s8, 256 }
 0x420   :  { %p660_p9 = scmp.ne.s32.totalorder %s859_s8, %s659_s16  ;;  %p663_p10 = scmp.lt.u32.totalorder %s659_s16, %s859_s8 }
 0x422   :  { %p665_p11 = pnand %p663_p10, %p660_p9 }
 0x424   :  { %668 = shalt.err (!%p665_p11)
}
 0x425   :  { %s686_s30 = smov 128   ;;  %s687_s22 = smov 8  }
 0x426   :  { %425 = dma.vmem_to_hbm [thread:$0]  %s420_s7, 256, %s859_s8, [#allocation4], %s686_s30, %s686_s30, %s687_s22  }
 0x427   :  { %675 = dma.done.wait [#allocation4], 256  }
 0x428   :  { %676 = vsyncadd [#allocation4], 4294967040 }
 0x429   :  { %429 = vsyncpa [#allocation3], 1 }
 0x42a   :  { %430 = vsyncpa [#allocation6], 1 }
 0x42b   :  { %431 = vsyncpa [#allocation9], 1 }
 0x42c   :  { %432 = vsyncpa [#allocation4], 1 }

</bundles_post_ra>
